<compile_context>
chip_gen: v7x
topology: tpu7x:2x2x1
jax: 0.10.0
libtpu: 0.0.40
codegen_flags: <defaults>
</compile_context>

<pallas_src>
import functools

import jax
import jax.numpy as jnp
from jax.experimental import pallas as pl
from jax.experimental.pallas import tpu as pltpu

_LANE = 128


def _round_up(n: int, m: int) -> int:
    return ((n + m - 1) // m) * m


@functools.lru_cache(maxsize=None)
def _chip_config():
    """(max_batch_tile, tensorcores_per_chip) from the attached device kind."""
    try:
        kind = jax.devices()[0].device_kind.lower()
    except Exception:  # pragma: no cover - defensive
        kind = ""
    if "v7" in kind:
        return 2048, 2      # 2 TensorCores; 32 MiB scoped-VMEM default
    if "v6" in kind:
        return 2048, 1      # 1 TensorCore;  32 MiB scoped-VMEM default
    # v5e and unknown chips: 16 MiB scoped-VMEM default -> stay at 1024.
    return 1024, 1


def _mlp_kernel(xt_ref,                      # (TB, dimx+dimt)   f32
                w1_ref, b1_ref,              # (dimx+dimt, emb)  f32, (1, emb)  f32
                w2_ref, b2_ref,              # (emb, emb)        bf16, (1, emb) f32
                w3_ref, b3_ref,              # (emb, 128)        bf16, (1, 128) f32
                o_ref):                      # (TB, 128)         f32
    xt = xt_ref[...]
    k1 = xt.shape[1]                         # static (dimx + dimt, e.g. 4)

    # ---- layer 1: Linear(dimx+dimt -> emb) as K broadcast-FMAs on the VPU ----
    # (TB,1) * (1,emb) broadcast multiplies; avoids a K=4 MXU matmul + concat.
    h = xt[:, 0:1] * w1_ref[0:1, :]
    for k in range(1, k1):                   # static, fully unrolled (k1 == 4)
        h = h + xt[:, k:k + 1] * w1_ref[k:k + 1, :]
    h = jnp.sin(h + b1_ref[...])             # (TB, emb) f32, implicit row-bcast

    # ---- layer 2: Linear(emb -> emb) on the MXU, bf16 operands, f32 acc ------
    h = jnp.dot(h.astype(jnp.bfloat16), w2_ref[...],
                preferred_element_type=jnp.float32) + b2_ref[...]
    h = jnp.sin(h)

    # ---- output layer: Linear(emb -> 128-padded dimx) on the MXU, bf16 -------
    out = jnp.dot(h.astype(jnp.bfloat16), w3_ref[...],
                  preferred_element_type=jnp.float32) + b3_ref[...]
    o_ref[...] = out.astype(o_ref.dtype)     # lane-dense (TB, 128) store


@functools.partial(jax.jit, static_argnames=("dimx", "batch_tile"))
def _concat_sin_mlp_call(xt, w1, b1, w2, b2, w3p, b3p, *, dimx, batch_tile=None):
    B, k1 = xt.shape
    emb = w1.shape[1]
    n_pad = w3p.shape[1]                      # lane-padded output width (128)

    max_tile, num_tc = _chip_config()
    if batch_tile is None:
        batch_tile = max_tile

    # Batch tile: multiple of 8 sublanes, no divisibility constraint on B
    # (we pad and slice back).
    tb = _round_up(min(batch_tile, _round_up(B, 8)), 8)
    # Only force >= 2 grid steps on 2-TensorCore parts (v7x) so the "parallel"
    # axis can be sharded across both cores; on 1-TC chips it is pure overhead.
    if num_tc >= 2 and tb >= 16 and _round_up(B, tb) // tb < 2:
        tb = _round_up(pl.cdiv(B, 2), 8)
    B_pad = _round_up(B, tb)
    if B_pad != B:
        xt = jnp.pad(xt, ((0, B_pad - B), (0, 0)))
    grid = (B_pad // tb,)

    full = lambda shape: pl.BlockSpec(shape, lambda i: (0, 0))

    cost = pl.CostEstimate(
        flops=2 * B_pad * emb * (k1 + emb + n_pad),
        transcendentals=2 * B_pad * emb,
        bytes_accessed=(B_pad * (k1 + n_pad) * 4             # activations in/out
                        + (k1 * emb + 2 * emb + n_pad) * 4   # f32 weights/biases
                        + (emb * emb + emb * n_pad) * 2),    # bf16 weights
    )

    out = pl.pallas_call(
        _mlp_kernel,
        out_shape=jax.ShapeDtypeStruct((B_pad, n_pad), jnp.float32),
        grid_spec=pl.GridSpec(
            grid=grid,
            in_specs=[
                pl.BlockSpec((tb, k1), lambda i: (i, 0)),   # [x|t] tile
                full((k1, emb)), full((1, emb)),            # layer 1 (f32)
                full((emb, emb)), full((1, emb)),           # layer 2 (w2 bf16)
                full((emb, n_pad)), full((1, n_pad)),       # output layer (w3 bf16, padded)
            ],
            out_specs=pl.BlockSpec((tb, n_pad), lambda i: (i, 0)),
        ),
        compiler_params=pltpu.CompilerParams(
            dimension_semantics=("parallel",)),
        cost_estimate=cost,
    )(xt, w1, b1, w2, b2, w3p, b3p)
    return out[:B, :dimx]


def prepare_params(params):
    """One-time weight prep (outside the per-call path): bf16 casts + lane pad."""
    w1 = jnp.asarray(params["w1"], jnp.float32)
    b1 = jnp.asarray(params["b1"], jnp.float32)
    w2 = jnp.asarray(params["w2"], jnp.float32).astype(jnp.bfloat16)
    b2 = jnp.asarray(params["b2"], jnp.float32)
    w3 = jnp.asarray(params["w3"], jnp.float32)
    b3 = jnp.asarray(params["b3"], jnp.float32)
    dimx = w3.shape[1]
    n_pad = _round_up(max(dimx, 1), _LANE)
    w3p = jnp.pad(w3, ((0, 0), (0, n_pad - dimx))).astype(jnp.bfloat16)
    b3p = jnp.pad(b3, ((0, 0), (0, n_pad - dimx)))
    return dict(w1=w1, b1=b1, w2=w2, b2=b2, w3=w3p, b3=b3p, dimx=dimx)


def concat_sin_mlp_forward(x, t, prepared, batch_tile=None):
    """Mirrors ConcatSinMLP.forward, including scalar-t broadcasting.

    `prepared` must come from prepare_params(raw_params).
    """
    x = jnp.asarray(x, jnp.float32)
    t = jnp.asarray(t, dtype=x.dtype)
    if t.ndim == 0:
        t = jnp.full((x.shape[0], 1), t, dtype=x.dtype)
    xt = jnp.concatenate([x, t], axis=1)       # one cheap concat in the wrapper
    return _concat_sin_mlp_call(
        xt,
        prepared["w1"], prepared["b1"],
        prepared["w2"], prepared["b2"],
        prepared["w3"], prepared["b3"],
        dimx=prepared["dimx"], batch_tile=batch_tile)


def init_params(key, dimx=3, dimt=1, emb_size=256):
    """Deterministic synthetic parameters (torch Linear init, stored transposed)."""
    ks = jax.random.split(key, 6)

    def lin(kw, kb, fan_in, fan_out):
        bound = 1.0 / jnp.sqrt(fan_in)
        w = jax.random.uniform(kw, (fan_in, fan_out), jnp.float32, -bound, bound)
        b = jax.random.uniform(kb, (1, fan_out), jnp.float32, -bound, bound)
        return w, b

    w1, b1 = lin(ks[0], ks[1], dimx + dimt, emb_size)
    w2, b2 = lin(ks[2], ks[3], emb_size, emb_size)
    w3, b3 = lin(ks[4], ks[5], emb_size, dimx)
    return dict(w1=w1, b1=b1, w2=w2, b2=b2, w3=w3, b3=b3)


def _reference(x, t, params):
    xt = jnp.concatenate([x, t], axis=1)
    h = jnp.sin(xt @ params["w1"] + params["b1"])
    h = jnp.sin(h @ params["w2"] + params["b2"])
    return h @ params["w3"] + params["b3"]


if __name__ == "__main__":
    key = jax.random.PRNGKey(0)
    k_param, k_x, k_t, k_x2, k_t2 = jax.random.split(key, 5)

    dimx, dimt, emb = 3, 1, 256
    params = init_params(k_param, dimx=dimx, dimt=dimt, emb_size=emb)
    prepared = prepare_params(params)          # bf16 cast + lane-pad done ONCE

    # Small case (single tile on 1-TC chips).
    B = 8
    x = jax.random.normal(k_x, (B, dimx), dtype=jnp.float32)
    t = jax.random.uniform(k_t, (B, dimt), dtype=jnp.float32)

    y = jax.block_until_ready(concat_sin_mlp_forward(x, t, prepared))
    y_ref = _reference(x, t, params)
    assert y.shape == (B, dimx)
    # bf16 layer-2/3 operands with f32 accumulation -> relaxed tolerance.
    assert jnp.allclose(y, y_ref, atol=2e-2, rtol=2e-2)

    # Scalar-t path (broadcast like the torch module).
    y_scalar = jax.block_until_ready(concat_sin_mlp_forward(x, 0.5, prepared))
    y_scalar_ref = _reference(x, jnp.full((B, dimt), 0.5, jnp.float32), params)
    assert jnp.allclose(y_scalar, y_scalar_ref, atol=2e-2, rtol=2e-2)

    # Ragged larger batch with an explicit small tile: exercises padding +
    # multi-step "parallel" grid.
    B2 = 1000
    x2 = jax.random.normal(k_x2, (B2, dimx), dtype=jnp.float32)
    t2 = jax.random.uniform(k_t2, (B2, dimt), dtype=jnp.float32)
    y2 = jax.block_until_ready(
        concat_sin_mlp_forward(x2, t2, prepared, batch_tile=256))
    y2_ref = _reference(x2, t2, params)
    assert y2.shape == (B2, dimx)
    assert jnp.allclose(y2, y2_ref, atol=2e-2, rtol=2e-2)

    # Default (chip-max) tile on the same ragged batch: single/dual step path.
    y3 = jax.block_until_ready(concat_sin_mlp_forward(x2, t2, prepared))
    assert jnp.allclose(y3, y2_ref, atol=2e-2, rtol=2e-2)

    print("KERNEL_OK")
</pallas_src>

<mosaic_0001>
module attributes {stable_mosaic.version = 11 : i64} {
  func.func @_mlp_kernel(%arg0: i32, %arg1: memref<8x4xf32, #tpu.memory_space<vmem>>, %arg2: memref<4x256xf32, #tpu.memory_space<vmem>>, %arg3: memref<1x256xf32, #tpu.memory_space<vmem>>, %arg4: memref<256x256xbf16, #tpu.memory_space<vmem>>, %arg5: memref<1x256xf32, #tpu.memory_space<vmem>>, %arg6: memref<256x128xbf16, #tpu.memory_space<vmem>>, %arg7: memref<1x128xf32, #tpu.memory_space<vmem>>, %arg8: memref<8x128xf32, #tpu.memory_space<vmem>>) attributes {dimension_semantics = [#tpu.dimension_semantics<parallel>], iteration_bounds = array<i64: 1>, scalar_prefetch = 0 : i64, scratch_operands = 0 : i64, tpu.core_type = #tpu.core_type<tc>, window_params = [{transform_indices = @transform_0, window_bounds = array<i64: 8, 4>}, {pipeline_mode = #tpu.pipeline_mode<synchronous>, transform_indices = @transform_1, window_bounds = array<i64: 4, 256>}, {pipeline_mode = #tpu.pipeline_mode<synchronous>, transform_indices = @transform_2, window_bounds = array<i64: 1, 256>}, {pipeline_mode = #tpu.pipeline_mode<synchronous>, transform_indices = @transform_3, window_bounds = array<i64: 256, 256>}, {pipeline_mode = #tpu.pipeline_mode<synchronous>, transform_indices = @transform_4, window_bounds = array<i64: 1, 256>}, {pipeline_mode = #tpu.pipeline_mode<synchronous>, transform_indices = @transform_5, window_bounds = array<i64: 256, 128>}, {pipeline_mode = #tpu.pipeline_mode<synchronous>, transform_indices = @transform_6, window_bounds = array<i64: 1, 128>}, {transform_indices = @transform_7, window_bounds = array<i64: 8, 128>}]} {
    %c0 = arith.constant 0 : index
    %c0_0 = arith.constant 0 : index
    %0 = vector.load %arg1[%c0, %c0_0] : memref<8x4xf32, #tpu.memory_space<vmem>>, vector<8x4xf32>
    %1 = vector.extract_strided_slice %0 {offsets = [0, 0], sizes = [8, 1], strides = [1, 1]} : vector<8x4xf32> to vector<8x1xf32>
    %c0_1 = arith.constant 0 : index
    %c0_2 = arith.constant 0 : index
    %2 = vector.load %arg2[%c0_1, %c0_2] : memref<4x256xf32, #tpu.memory_space<vmem>>, vector<1x256xf32>
    %3 = vector.broadcast %1 : vector<8x1xf32> to vector<8x256xf32>
    %4 = vector.broadcast %2 : vector<1x256xf32> to vector<8x256xf32>
    %5 = arith.mulf %3, %4 : vector<8x256xf32>
    %6 = vector.extract_strided_slice %0 {offsets = [0, 1], sizes = [8, 1], strides = [1, 1]} : vector<8x4xf32> to vector<8x1xf32>
    %c1 = arith.constant 1 : index
    %c0_3 = arith.constant 0 : index
    %7 = vector.load %arg2[%c1, %c0_3] : memref<4x256xf32, #tpu.memory_space<vmem>>, vector<1x256xf32>
    %8 = vector.broadcast %6 : vector<8x1xf32> to vector<8x256xf32>
    %9 = vector.broadcast %7 : vector<1x256xf32> to vector<8x256xf32>
    %10 = arith.mulf %8, %9 : vector<8x256xf32>
    %11 = arith.addf %5, %10 : vector<8x256xf32>
    %12 = vector.extract_strided_slice %0 {offsets = [0, 2], sizes = [8, 1], strides = [1, 1]} : vector<8x4xf32> to vector<8x1xf32>
    %c2 = arith.constant 2 : index
    %c0_4 = arith.constant 0 : index
    %13 = vector.load %arg2[%c2, %c0_4] : memref<4x256xf32, #tpu.memory_space<vmem>>, vector<1x256xf32>
    %14 = vector.broadcast %12 : vector<8x1xf32> to vector<8x256xf32>
    %15 = vector.broadcast %13 : vector<1x256xf32> to vector<8x256xf32>
    %16 = arith.mulf %14, %15 : vector<8x256xf32>
    %17 = arith.addf %11, %16 : vector<8x256xf32>
    %18 = vector.extract_strided_slice %0 {offsets = [0, 3], sizes = [8, 1], strides = [1, 1]} : vector<8x4xf32> to vector<8x1xf32>
    %c3 = arith.constant 3 : index
    %c0_5 = arith.constant 0 : index
    %19 = vector.load %arg2[%c3, %c0_5] : memref<4x256xf32, #tpu.memory_space<vmem>>, vector<1x256xf32>
    %20 = vector.broadcast %18 : vector<8x1xf32> to vector<8x256xf32>
    %21 = vector.broadcast %19 : vector<1x256xf32> to vector<8x256xf32>
    %22 = arith.mulf %20, %21 : vector<8x256xf32>
    %23 = arith.addf %17, %22 : vector<8x256xf32>
    %c0_6 = arith.constant 0 : index
    %c0_7 = arith.constant 0 : index
    %24 = vector.load %arg3[%c0_6, %c0_7] : memref<1x256xf32, #tpu.memory_space<vmem>>, vector<1x256xf32>
    %25 = vector.broadcast %24 : vector<1x256xf32> to vector<8x256xf32>
    %26 = arith.addf %23, %25 : vector<8x256xf32>
    %27 = math.sin %26 : vector<8x256xf32>
    %28 = arith.truncf %27 : vector<8x256xf32> to vector<8x256xbf16>
    %c0_8 = arith.constant 0 : index
    %c0_9 = arith.constant 0 : index
    %29 = vector.load %arg4[%c0_8, %c0_9] : memref<256x256xbf16, #tpu.memory_space<vmem>>, vector<256x256xbf16>
    %cst = arith.constant dense<0.000000e+00> : vector<8x256xf32>
    %30 = tpu.matmul %28, %29, %cst {dimension_numbers = #tpu.dot_dimension_numbers<[1], [0], [0], [1], [0, 0, 1, 1], [], []>} : vector<8x256xbf16>, vector<256x256xbf16>, vector<8x256xf32> -> vector<8x256xf32>
    %c0_10 = arith.constant 0 : index
    %c0_11 = arith.constant 0 : index
    %31 = vector.load %arg5[%c0_10, %c0_11] : memref<1x256xf32, #tpu.memory_space<vmem>>, vector<1x256xf32>
    %32 = vector.broadcast %31 : vector<1x256xf32> to vector<8x256xf32>
    %33 = arith.addf %30, %32 : vector<8x256xf32>
    %34 = math.sin %33 : vector<8x256xf32>
    %35 = arith.truncf %34 : vector<8x256xf32> to vector<8x256xbf16>
    %c0_12 = arith.constant 0 : index
    %c0_13 = arith.constant 0 : index
    %36 = vector.load %arg6[%c0_12, %c0_13] : memref<256x128xbf16, #tpu.memory_space<vmem>>, vector<256x128xbf16>
    %cst_14 = arith.constant dense<0.000000e+00> : vector<8x128xf32>
    %37 = tpu.matmul %35, %36, %cst_14 {dimension_numbers = #tpu.dot_dimension_numbers<[1], [0], [0], [1], [0, 0, 1, 1], [], []>} : vector<8x256xbf16>, vector<256x128xbf16>, vector<8x128xf32> -> vector<8x128xf32>
    %c0_15 = arith.constant 0 : index
    %c0_16 = arith.constant 0 : index
    %38 = vector.load %arg7[%c0_15, %c0_16] : memref<1x128xf32, #tpu.memory_space<vmem>>, vector<1x128xf32>
    %39 = vector.broadcast %38 : vector<1x128xf32> to vector<8x128xf32>
    %40 = arith.addf %37, %39 : vector<8x128xf32>
    %c0_17 = arith.constant 0 : index
    %c0_18 = arith.constant 0 : index
    %41 = vector.load %arg8[%c0_17, %c0_18] : memref<8x128xf32, #tpu.memory_space<vmem>>, vector<8x128xf32>
    tpu.vector_store %arg8[%c0_17, %c0_18], %40 {strides = array<i32>} : memref<8x128xf32, #tpu.memory_space<vmem>>, vector<8x128xf32>,
    return
  }
  func.func @transform_0(%arg0: i32) -> (i32, i32) {
    %c0_i32 = arith.constant 0 : i32
    %c0_i32_0 = arith.constant 0 : i32
    return %arg0, %c0_i32 : i32, i32
  }
  func.func @transform_1(%arg0: i32) -> (i32, i32) {
    %c0_i32 = arith.constant 0 : i32
    %c0_i32_0 = arith.constant 0 : i32
    %c0_i32_1 = arith.constant 0 : i32
    return %c0_i32, %c0_i32_0 : i32, i32
  }
  func.func @transform_2(%arg0: i32) -> (i32, i32) {
    %c0_i32 = arith.constant 0 : i32
    %c0_i32_0 = arith.constant 0 : i32
    %c0_i32_1 = arith.constant 0 : i32
    return %c0_i32, %c0_i32_0 : i32, i32
  }
  func.func @transform_3(%arg0: i32) -> (i32, i32) {
    %c0_i32 = arith.constant 0 : i32
    %c0_i32_0 = arith.constant 0 : i32
    %c0_i32_1 = arith.constant 0 : i32
    return %c0_i32, %c0_i32_0 : i32, i32
  }
  func.func @transform_4(%arg0: i32) -> (i32, i32) {
    %c0_i32 = arith.constant 0 : i32
    %c0_i32_0 = arith.constant 0 : i32
    %c0_i32_1 = arith.constant 0 : i32
    return %c0_i32, %c0_i32_0 : i32, i32
  }
  func.func @transform_5(%arg0: i32) -> (i32, i32) {
    %c0_i32 = arith.constant 0 : i32
    %c0_i32_0 = arith.constant 0 : i32
    %c0_i32_1 = arith.constant 0 : i32
    return %c0_i32, %c0_i32_0 : i32, i32
  }
  func.func @transform_6(%arg0: i32) -> (i32, i32) {
    %c0_i32 = arith.constant 0 : i32
    %c0_i32_0 = arith.constant 0 : i32
    %c0_i32_1 = arith.constant 0 : i32
    return %c0_i32, %c0_i32_0 : i32, i32
  }
  func.func @transform_7(%arg0: i32) -> (i32, i32) {
    %c0_i32 = arith.constant 0 : i32
    %c0_i32_0 = arith.constant 0 : i32
    return %arg0, %c0_i32 : i32, i32
  }
}

</mosaic_0001>

<bundles_post_ra>
// kernel: _concat_sin_mlp_call.1
= control target key start
LH: loop header
LB: loop body
LE: loop exit
PB: predicated region body
PF: predicated region fallthrough
CT: control target
= control target key end

     0   :  { %12 = vsyncpa [#allocation3], 0  ;;  %s1568_s0 = inlined_call_operand.vmem [shape: f32[8,4], index: 0, kind: input, shape index: {}]   ;;  %s1569_s1 = inlined_call_operand.vmem [shape: f32[4,256], index: 1, kind: input, shape index: {}]   ;;  %s1570_s2 = inlined_call_operand.vmem [shape: f32[1,256], index: 2, kind: input, shape index: {}]   ;;  %s1571_s3 = inlined_call_operand.hbm [shape: bf16[256,256], index: 3, kind: input, shape index: {}]   ;;  %s1572_s4 = inlined_call_operand.vmem [shape: f32[1,256], index: 4, kind: input, shape index: {}]   ;;  %s1573_s5 = inlined_call_operand.hbm [shape: bf16[256,128], index: 5, kind: input, shape index: {}]   ;;  %s1574_s6 = inlined_call_operand.vmem [shape: f32[1,128], index: 6, kind: input, shape index: {}]   ;;  %s1575_s7 = inlined_call_operand.vmem [shape: f32[8,128], index: 7, kind: output, shape index: {}]  }
   0x1   :  { %13 = vsyncpa [#allocation5], 0  ;;  %s1254_s24 = smov [#allocation2]   ;;  %s1206_s28 = scalar_lea.hbm %s1571_s3, 4096 }
   0x2   :  { %s25_s25 = sshll.u32 %s1254_s24, 4  ;;  %p1207_p0 = scmp.ne.s32.totalorder %s1571_s3, %s1206_s28  ;;  %s26_s25 = int_to_ptr.vmem [resolvable:$true] %s25_s25 }
   0x3   :  { %p1210_p1 = scmp.lt.u32.totalorder %s1206_s28, %s1571_s3 }
   0x5   :  { %p1212_p2 = pnand %p1210_p1, %p1207_p0 }
   0x7   :  { %1215 = shalt.err (!%p1212_p2)
}
   0x8   :  { %s1216_s10 = scalar_lea.vmem %s26_s25, 4096  ;;  %p1221_p4 = scmp.lt.s32.totalorder %s26_s25, %s26_s25 }
   0x9   :  { %p1217_p3 = scmp.ne.s32.totalorder %s26_s25, %s1216_s10  ;;  %p1222_p5 = scmp.lt.s32.totalorder %s1216_s10, %s1216_s10 }
   0xb   :  { %p1223_p6 = por %p1222_p5, %p1221_p4 }
   0xd   :  { %p1224_p7 = pnand %p1223_p6, %p1217_p3 }
   0xf   :  { %1227 = shalt.err (!%p1224_p7)
}
  0x10   :  { %s1255_s11 = smov 128   ;;  %s1256_s12 = smov 8  }
  0x11   :  { %31 = dma.hbm_to_vmem [thread:$0]  %s1571_s3, 4096, %s26_s25, [#allocation3], %s1255_s11, %s1255_s11, %s1256_s12  }
  0x12   :  { %s1257_s15 = smov [#allocation4]   ;;  %s1228_s19 = scalar_lea.hbm %s1573_s5, 2048 }
  0x13   :  { %s39_s16 = sshll.u32 %s1257_s15, 4  ;;  %p1229_p8 = scmp.ne.s32.totalorder %s1573_s5, %s1228_s19  ;;  %s40_s16 = int_to_ptr.vmem [resolvable:$true] %s39_s16 }
  0x14   :  { %p1232_p9 = scmp.lt.u32.totalorder %s1228_s19, %s1573_s5 }
  0x16   :  { %p1234_p10 = pnand %p1232_p9, %p1229_p8 }
  0x18   :  { %1237 = shalt.err (!%p1234_p10)
}
  0x19   :  { %s1238_s24 = scalar_lea.vmem %s40_s16, 2048  ;;  %p1243_p12 = scmp.lt.s32.totalorder %s40_s16, %s40_s16 }
  0x1a   :  { %p1239_p11 = scmp.ne.s32.totalorder %s40_s16, %s1238_s24  ;;  %p1244_p13 = scmp.lt.s32.totalorder %s1238_s24, %s1238_s24 }
  0x1c   :  { %p1245_p0 = por %p1244_p13, %p1243_p12 }
  0x1e   :  { %p1246_p1 = pnand %p1245_p0, %p1239_p11 }
  0x20   :  { %1249 = shalt.err (!%p1246_p1)
}
  0x21   :  { %s1258_s3 = smov 64   ;;  %s1259_s25 = smov 4  }
  0x22   :  { %45 = dma.hbm_to_vmem [thread:$0]  %s1573_s5, 2048, %s40_s16, [#allocation5], %s1258_s3, %s1258_s3, %s1259_s25  }
  0x23   :  { %1250 = dma.done.wait [#allocation3], 4096  }
  0x24   :  { %1251 = vsyncadd [#allocation3], 4294963200 }
  0x25   :  { %1252 = dma.done.wait [#allocation5], 2048  }
  0x26   :  { %1253 = vsyncadd [#allocation5], 4294965248  ;;  %v1260_v0 = vmov 0   ;;  %v1261_v1 = vmov 2   ;;  %v55_v2 = vld [vmem:[%s1568_s0] sm:$0xff]  ;;  %v1262_v3 = vmov 1   ;;  %v63_v37 = vlaneseq }
  0x27   :  { %1121 = vset.pattern.permute.xlu0 %v1260_v0  ;;  %1123 = vset.pattern.permute.xlu1 %v1261_v1  ;;  %v1263_v4 = vmov 3   ;;  %v1126_v5 = vld [vmem:[#allocation2 + $0x4] ss:$8 sps:$4 sm:$0xff]   ;;  %v1128_v6 = vld [vmem:[#allocation2] ss:$8 sps:$4 sm:$0xff]  }
  0x28   :  { %59 = vperm.xlu0 %1121, %v55_v2   ;;  %99 = vperm.xlu1 %1123, %v55_v2   ;;  %v1129_v7 = vld [vmem:[#allocation2 + $0x14] ss:$8 sps:$4 sm:$0xff]   ;;  %v1131_v8 = vld [vmem:[#allocation2 + $0x10] ss:$8 sps:$4 sm:$0xff]   ;;  %v1132_v9 = vld [vmem:[#allocation2 + $0x24] ss:$8 sps:$4 sm:$0xff]  }
  0x29   :  { %566 = vmatprep.subr.bf16.mxu0 %v1126_v5  ;;  %v1134_v10 = vld [vmem:[#allocation2 + $0x20] ss:$8 sps:$4 sm:$0xff]   ;;  %v1135_v11 = vld [vmem:[#allocation2 + $0x34] ss:$8 sps:$4 sm:$0xff]   ;;  %v1137_v12 = vld [vmem:[#allocation2 + $0x30] ss:$8 sps:$4 sm:$0xff]  }
  0x2a   :  { %567 = vmatpush1.bf16.msra.mxu0 %v1128_v6  ;;  %v1138_v13 = vld [vmem:[#allocation2 + $0x44] ss:$8 sps:$4 sm:$0xff]   ;;  %v1140_v14 = vld [vmem:[#allocation2 + $0x40] ss:$8 sps:$4 sm:$0xff]   ;;  %v1141_v15 = vld [vmem:[#allocation2 + $0x54] ss:$8 sps:$4 sm:$0xff]  }
  0x2b   :  { %568 = vmatprep.subr.bf16.mxu0 %v1129_v7  ;;  %v1143_v16 = vld [vmem:[#allocation2 + $0x50] ss:$8 sps:$4 sm:$0xff]   ;;  %v1144_v17 = vld [vmem:[#allocation2 + $0x64] ss:$8 sps:$4 sm:$0xff]   ;;  %v1146_v18 = vld [vmem:[#allocation2 + $0x60] ss:$8 sps:$4 sm:$0xff]  }
  0x2c   :  { %1122 = vset.pattern.permute.xlu0 %v1262_v3  ;;  %1124 = vset.pattern.permute.xlu1 %v1263_v4  ;;  %v1147_v19 = vld [vmem:[#allocation2 + $0x74] ss:$8 sps:$4 sm:$0xff]   ;;  %v1149_v20 = vld [vmem:[#allocation2 + $0x70] ss:$8 sps:$4 sm:$0xff]   ;;  %v1150_v21 = vld [vmem:[#allocation2 + $0x84] ss:$8 sps:$4 sm:$0xff]  }
  0x2d   :  { %78 = vperm.xlu0 %1122, %v55_v2   ;;  %120 = vperm.xlu1 %1124, %v55_v2   ;;  %v1152_v22 = vld [vmem:[#allocation2 + $0x80] ss:$8 sps:$4 sm:$0xff]   ;;  %v1153_v23 = vld [vmem:[#allocation2 + $0x94] ss:$8 sps:$4 sm:$0xff]   ;;  %v1155_v24 = vld [vmem:[#allocation2 + $0x90] ss:$8 sps:$4 sm:$0xff]  }
  0x2e   :  { %569 = vmatpush1.bf16.msra.mxu0 %v1131_v8  ;;  %v1156_v25 = vld [vmem:[#allocation2 + $0xa4] ss:$8 sps:$4 sm:$0xff]   ;;  %v1158_v26 = vld [vmem:[#allocation2 + $0xa0] ss:$8 sps:$4 sm:$0xff]   ;;  %v1159_v27 = vld [vmem:[#allocation2 + $0xb4] ss:$8 sps:$4 sm:$0xff]  }
  0x2f   :  { %570 = vmatprep.subr.bf16.mxu0 %v1132_v9  ;;  %v1161_v28 = vld [vmem:[#allocation2 + $0xb0] ss:$8 sps:$4 sm:$0xff]   ;;  %v1162_v29 = vld [vmem:[#allocation2 + $0xc4] ss:$8 sps:$4 sm:$0xff]   ;;  %v1164_v30 = vld [vmem:[#allocation2 + $0xc0] ss:$8 sps:$4 sm:$0xff]  }
  0x30   :  { %v1165_v31 = vld [vmem:[#allocation2 + $0xd4] ss:$8 sps:$4 sm:$0xff]   ;;  %v1167_v32 = vld [vmem:[#allocation2 + $0xd0] ss:$8 sps:$4 sm:$0xff]   ;;  %v1168_v33 = vld [vmem:[#allocation2 + $0xe4] ss:$8 sps:$4 sm:$0xff]  }
  0x31   :  { %1125 = vset.pattern.permute.xlu0 %v1263_v4  ;;  %v1170_v34 = vld [vmem:[#allocation2 + $0xe0] ss:$8 sps:$4 sm:$0xff]   ;;  %v1171_v35 = vld [vmem:[#allocation2 + $0xf4] ss:$8 sps:$4 sm:$0xff]   ;;  %v1173_v36 = vld [vmem:[#allocation2 + $0xf0] ss:$8 sps:$4 sm:$0xff]  }
  0x32   :  { %571 = vmatpush1.bf16.msra.mxu0 %v1134_v10  ;;  %v64_v38 = vshrl.u32 %v63_v37, 7  ;;  %v56_v41 = vld [vmem:[%s1569_s1] ss:$4 sm:$0x3]  ;;  %v1265_v37 = vmov 920167782  }
  0x33   :  { %572 = vmatprep.subr.bf16.mxu0 %v1135_v11  ;;  %v999_v42 = vld [vmem:[%s1569_s1 + $0x1] ss:$4 sm:$0x3]  ;;  %v1000_v44 = vld [vmem:[%s1569_s1 + $0x2] ss:$4 sm:$0x3] }
  0x34   :  { %v1337_v39 = vsub.s32 0, %v64_v38  ;;  %v1339_v40 = vsub.s32 1, %v64_v38  ;;  %v1001_v46 = vld [vmem:[%s1569_s1 + $0x3] ss:$4 sm:$0x3] }
  0x35   :  { %v138_v63 = vld [vmem:[%s1570_s2] sm:$0x3] }
  0x36   :  { %573 = vmatpush1.bf16.msra.mxu0 %v1137_v12  ;;  %v66_v47 = vrot.slane %v56_v41, %v1337_v39  ;;  %v70_v48 = vrot.slane %v56_v41, %v1339_v40  ;;  %v85_v49 = vrot.slane %v999_v42, %v1337_v39  ;;  %v89_v50 = vrot.slane %v999_v42, %v1339_v40 }
  0x37   :  { %574 = vmatprep.subr.bf16.mxu0 %v1138_v13  ;;  %v106_v51 = vrot.slane %v1000_v44, %v1337_v39  ;;  %v110_v52 = vrot.slane %v1000_v44, %v1339_v40  ;;  %v127_v53 = vrot.slane %v1001_v46, %v1337_v39  ;;  %v131_v54 = vrot.slane %v1001_v46, %v1339_v40 }
  0x38   :  { %v143_v4 = vrot.slane %v138_v63, %v1337_v39  ;;  %v147_v5 = vrot.slane %v138_v63, %v1339_v40  ;;  %v1266_v42 = vmov 683565275  }
  0x3a   :  { %575 = vmatpush1.bf16.msra.mxu0 %v1140_v14 }
  0x3b   :  { %576 = vmatprep.subr.bf16.mxu0 %v1141_v15 }
  0x3e   :  { %577 = vmatpush1.bf16.msra.mxu0 %v1143_v16 }
  0x3f   :  { %578 = vmatprep.subr.bf16.mxu0 %v1144_v17 }
  0x42   :  { %579 = vmatpush1.bf16.msra.mxu0 %v1146_v18 }
  0x43   :  { %580 = vmatprep.subr.bf16.mxu0 %v1147_v19 }
  0x46   :  { %581 = vmatpush1.bf16.msra.mxu0 %v1149_v20 }
  0x47   :  { %582 = vmatprep.subr.bf16.mxu0 %v1150_v21 }
  0x4a   :  { %583 = vmatpush1.bf16.msra.mxu0 %v1152_v22 }
  0x4b   :  { %584 = vmatprep.subr.bf16.mxu0 %v1153_v23 }
  0x4e   :  { %585 = vmatpush1.bf16.msra.mxu0 %v1155_v24 }
  0x4f   :  { %586 = vmatprep.subr.bf16.mxu0 %v1156_v25 }
  0x52   :  { %587 = vmatpush1.bf16.msra.mxu0 %v1158_v26 }
  0x53   :  { %588 = vmatprep.subr.bf16.mxu0 %v1159_v27 }
  0x56   :  { %589 = vmatpush1.bf16.msra.mxu0 %v1161_v28 }
  0x57   :  { %590 = vmatprep.subr.bf16.mxu0 %v1162_v29 }
  0x5a   :  { %591 = vmatpush1.bf16.msra.mxu0 %v1164_v30 }
  0x5b   :  { %592 = vmatprep.subr.bf16.mxu0 %v1165_v31 }
  0x5e   :  { %593 = vmatpush1.bf16.msra.mxu0 %v1167_v32 }
  0x5f   :  { %594 = vmatprep.subr.bf16.mxu0 %v1168_v33 }
  0x62   :  { %595 = vmatpush1.bf16.msra.mxu0 %v1170_v34 }
  0x63   :  { %596 = vmatprep.subr.bf16.mxu0 %v1171_v35  ;;  %v1264_v35 = vmov 2102212464  }
  0x66   :  { %597 = vmatpush1.bf16.msra.mxu0 %v1173_v36 }
  0xa7   :  { %v60_v43 = vpop.permute.xlu0 %59  ;;  %v100_v45 = vpop.permute.xlu1 %99 }
  0xa8   :  { %v73_v57 = vmul.f32 %v66_v47, %v60_v43  ;;  %v74_v58 = vmul.f32 %v70_v48, %v60_v43  ;;  %v113_v61 = vmul.f32 %v106_v51, %v100_v45  ;;  %v114_v62 = vmul.f32 %v110_v52, %v100_v45 }
  0xa9   :  { %v1267_v45 = vmov 1326507024   ;;  %v1268_v47 = vmov 2475754826  }
  0xac   :  { %v79_v55 = vpop.permute.xlu0 %78  ;;  %v121_v56 = vpop.permute.xlu1 %120 }
  0xad   :  { %v92_v59 = vmul.f32 %v85_v49, %v79_v55  ;;  %v93_v60 = vmul.f32 %v89_v50, %v79_v55  ;;  %v134_v2 = vmul.f32 %v127_v53, %v121_v56  ;;  %v135_v3 = vmul.f32 %v131_v54, %v121_v56 }
  0xae   :  { %v1269_v49 = vmov 2131351028  }
  0xaf   :  { %v94_v0 = vadd.f32 %v92_v59, %v73_v57  ;;  %v95_v1 = vadd.f32 %v93_v60, %v74_v58 }
  0xb1   :  { %v115_v6 = vadd.f32 %v113_v61, %v94_v0  ;;  %v116_v7 = vadd.f32 %v114_v62, %v95_v1 }
  0xb3   :  { %v136_v8 = vadd.f32 %v134_v2, %v115_v6  ;;  %v137_v9 = vadd.f32 %v135_v3, %v116_v7 }
  0xb5   :  { %v1366_v10 = vadd.f32 %v143_v4, %v136_v8  ;;  %v1368_v11 = vadd.f32 %v147_v5, %v137_v9 }
  0xb7   :  { %v155_v12 = vand.u32 2139095040, %v1366_v10  ;;  %v259_v13 = vand.u32 2139095040, %v1368_v11  ;;  %v256_v14 = vand.u32 2147483647, %v1368_v11  ;;  %v152_v15 = vand.u32 2147483647, %v1366_v10 }
  0xb8   :  { %vm258_vm14 = vcmp.lt.s32.totalorder %v1368_v11, 0 }
  0xb9   :  { %v156_v16 = vshrl.u32 %v155_v12, 23  ;;  %v260_v17 = vshrl.u32 %v259_v13, 23  ;;  %v263_v18 = vand.u32 8388607, %v256_v14  ;;  %v159_v21 = vand.u32 8388607, %v152_v15 }
  0xba   :  { %vm257_vm15 = vcmp.le.f32.partialorder %v256_v14, 0.7853982 }
  0xbb   :  { %v1002_v19 = vadd.s32 4294967169, %v156_v16  ;;  %v1006_v20 = vadd.s32 4294967169, %v260_v17  ;;  %v264_v24 = vor.u32 8388608, %v263_v18  ;;  %v160_v25 = vor.u32 8388608, %v159_v21 }
  0xbd   :  { %v162_v22 = vadd.s32 1, %v1002_v19  ;;  %v266_v23 = vadd.s32 1, %v1006_v20  ;;  %v1378_v30 = vshll.u32 %v264_v24, 8  ;;  %v1382_v34 = vshll.u32 %v160_v25, 8 }
  0xbf   :  { %vm163_vm0 = vcmp.gt.s32.totalorder %v162_v22, 0  ;;  %vm267_vm1 = vcmp.gt.s32.totalorder %v266_v23, 0 }
  0xc0   :  { %v164_v26 = vsel %vm163_vm0, %v162_v22, 0  ;;  %v268_v27 = vsel %vm267_vm1, %v266_v23, 0  ;;  %vm154_vm0 = vcmp.lt.s32.totalorder %v1366_v10, 0  ;;  %vm153_vm1 = vcmp.le.f32.partialorder %v152_v15, 0.7853982 }
  0xc1   :  { %v166_v28 = vand.u32 31, %v164_v26  ;;  %v270_v29 = vand.u32 31, %v268_v27  ;;  %v1380_v31 = vshrl.u32 %v164_v26, 5  ;;  %v269_v33 = vshrl.u32 %v268_v27, 5 }
  0xc3   :  { %v167_v32 = vsub.s32 32, %v166_v28  ;;  %v178_v36 = vshll.u32 %v1264_v35, %v166_v28  ;;  %v181_v38 = vshll.u32 %v1265_v37, %v166_v28  ;;  %v271_v41 = vsub.s32 32, %v270_v29 }
  0xc4   :  { %v273_v43 = vshll.u32 %v1266_v42, %v270_v29  ;;  %v276_v48 = vshll.u32 %v1268_v47, %v270_v29  ;;  %v279_v50 = vshll.u32 %v1269_v49, %v270_v29  ;;  %v282_v54 = vshll.u32 %v1264_v35, %v270_v29 }
  0xc5   :  { %v179_v44 = vshrl.u32 %v1265_v37, %v167_v32  ;;  %v182_v46 = vshrl.u32 %v1267_v45, %v167_v32  ;;  %v274_v51 = vshrl.u32 %v1268_v47, %v271_v41  ;;  %v277_v52 = vshrl.u32 %v1269_v49, %v271_v41 }
  0xc6   :  { %v280_v53 = vshrl.u32 %v1264_v35, %v271_v41  ;;  %v272_v55 = vshrl.u32 %v1266_v42, %v271_v41  ;;  %v283_v56 = vshrl.u32 %v1265_v37, %v271_v41  ;;  %v285_v57 = vshll.u32 %v1265_v37, %v270_v29 }
  0xc7   :  { %v286_v58 = vshrl.u32 %v1267_v45, %v271_v41  ;;  %v180_v59 = vor.u32 %v179_v44, %v178_v36  ;;  %v275_v60 = vor.u32 %v274_v51, %v273_v43  ;;  %v278_v61 = vor.u32 %v277_v52, %v276_v48 }
  0xc8   :  { %v281_v62 = vor.u32 %v280_v53, %v279_v50  ;;  %v183_v63 = vor.u32 %v182_v46, %v181_v38  ;;  %v284_v0 = vor.u32 %v283_v56, %v282_v54  ;;  %vm288_vm2 = vcmp.lt.s32.totalorder %v269_v33, 1 }
  0xc9   :  { %v287_v1 = vor.u32 %v286_v58, %v285_v57  ;;  %vm187_vm3 = vcmp.lt.s32.totalorder %v1380_v31, 4  ;;  %vm290_vm4 = vcmp.lt.s32.totalorder %v269_v33, 3  ;;  %vm291_vm5 = vcmp.lt.s32.totalorder %v269_v33, 4 }
  0xca   :  { %v292_v2 = vsel %vm288_vm2, %v272_v55, %v275_v60  ;;  %v293_v3 = vsel %vm291_vm5, %v281_v62, 2102212464  ;;  %v296_v4 = vsel %vm288_vm2, %v275_v60, %v278_v61  ;;  %v297_v5 = vsel %vm291_vm5, %v284_v0, 920167782 }
  0xcb   :  { %v300_v6 = vsel %vm288_vm2, %v278_v61, %v281_v62  ;;  %vm289_vm6 = vcmp.lt.s32.totalorder %v269_v33, 2  ;;  %v294_v7 = vsel %vm290_vm4, %v278_v61, %v293_v3  ;;  %v298_v8 = vsel %vm290_vm4, %v281_v62, %v297_v5 }
  0xcc   :  { %v301_v9 = vsel %vm291_vm5, %v287_v1, 1326507024  ;;  %v193_v12 = vsel %vm187_vm3, %v180_v59, 920167782  ;;  %v197_v13 = vsel %vm187_vm3, %v183_v63, 1326507024  ;;  %v299_v16 = vsel %vm289_vm6, %v296_v4, %v298_v8 }
  0xcd   :  { %v302_v17 = vsel %vm290_vm4, %v284_v0, %v301_v9  ;;  %v295_v18 = vsel %vm289_vm6, %v292_v2, %v294_v7  ;;  %v1405_v20 = vmul.u32.u64.low %v1378_v30, %v299_v16  ;;  %v1406_v21 = vmul.u32.u64.high %v1378_v30, %v299_v16, %v1405_v20 }
  0xce   :  { %v303_v19 = vsel %vm289_vm6, %v300_v6, %v302_v17  ;;  %v169_v24 = vshll.u32 %v1266_v42, %v166_v28  ;;  %v170_v25 = vshrl.u32 %v1268_v47, %v167_v32  ;;  %v172_v26 = vshll.u32 %v1268_v47, %v166_v28 }
  0xcf   :  { %v1409_v22 = vmul.u32.u64.low %v1378_v30, %v303_v19  ;;  %v1410_v23 = vmul.u32.u64.high %v1378_v30, %v303_v19, %v1409_v22  ;;  %v173_v27 = vshrl.u32 %v1269_v49, %v167_v32  ;;  %v175_v29 = vshll.u32 %v1269_v49, %v166_v28 }
  0xd0   :  { %v176_v33 = vshrl.u32 %v1264_v35, %v167_v32  ;;  %v311_v36 = vmul.u32 %v1378_v30, %v295_v18  ;;  %v168_v38 = vshrl.u32 %v1266_v42, %v167_v32  ;;  %v171_v41 = vor.u32 %v170_v25, %v169_v24 }
  0xd1   :  { %vm184_vm7 = vcmp.lt.s32.totalorder %v1380_v31, 1  ;;  %v314_v43 = vadd.s32 1, %v1406_v21  ;;  %v174_v44 = vor.u32 %v173_v27, %v172_v26  ;;  %vm186_vm8 = vcmp.lt.s32.totalorder %v1380_v31, 3 }
  0xd2   :  { %v177_v46 = vor.u32 %v176_v33, %v175_v29  ;;  %vm313_vm9 = vc.u32 %v1410_v23, %v1405_v20  ;;  %vm185_vm10 = vcmp.lt.s32.totalorder %v1380_v31, 2  ;;  %v188_v28 = vsel %vm184_vm7, %v168_v38, %v171_v41 }
  0xd3   :  { %v198_v48 = vsel %vm186_vm8, %v180_v59, %v197_v13  ;;  %v315_v30 = vsel %vm313_vm9, %v314_v43, %v1406_v21  ;;  %v192_v50 = vsel %vm184_vm7, %v171_v41, %v174_v44  ;;  %v312_v19 = vadd.s32 %v1405_v20, %v1410_v23 }
  0xd4   :  { %v189_v32 = vsel %vm187_vm3, %v177_v46, 2102212464  ;;  %v194_v51 = vsel %vm186_vm8, %v177_v46, %v193_v12  ;;  %v316_v52 = vadd.s32 %v315_v30, %v311_v36  ;;  %v196_v55 = vsel %vm184_vm7, %v174_v44, %v177_v46 }
  0xd5   :  { %v190_v53 = vsel %vm186_vm8, %v174_v44, %v189_v32  ;;  %v195_v54 = vsel %vm185_vm10, %v192_v50, %v194_v51  ;;  %v199_v56 = vsel %vm185_vm10, %v196_v55, %v198_v48  ;;  %vm348_vm5 = vweird.f32 %v1368_v11 }
  0xd6   :  { %v1435_v57 = vmul.u32.u64.low %v1382_v34, %v195_v54  ;;  %v1436_v58 = vmul.u32.u64.high %v1382_v34, %v195_v54, %v1435_v57  ;;  %v317_v59 = vadd.s32 536870912, %v316_v52  ;;  %v191_v62 = vsel %vm185_vm10, %v188_v28, %v190_v53 }
  0xd7   :  { %v1439_v60 = vmul.u32.u64.low %v1382_v34, %v199_v56  ;;  %v1440_v61 = vmul.u32.u64.high %v1382_v34, %v199_v56, %v1439_v60  ;;  %v207_v2 = vmul.u32 %v1382_v34, %v191_v62  ;;  %vm244_vm9 = vweird.f32 %v1366_v10 }
  0xd8   :  { %v318_v63 = vshrl.u32 %v317_v59, 30  ;;  %v210_v0 = vadd.s32 1, %v1436_v58 }
  0xd9   :  { %vm209_vm11 = vc.u32 %v1440_v61, %v1435_v57  ;;  %v208_v46 = vadd.s32 %v1435_v57, %v1440_v61 }
  0xda   :  { %v319_v1 = vshll.u32 %v318_v63, 30  ;;  %v211_v31 = vsel %vm209_vm11, %v210_v0, %v1436_v58  ;;  %v342_v23 = vsub.s32 4, %v318_v63 }
  0xdb   :  { %v212_v4 = vadd.s32 %v211_v31, %v207_v2 }
  0xdc   :  { %v320_v3 = vsub.s32 %v316_v52, %v319_v1  ;;  %v343_v55 = vsel %vm258_vm14, %v342_v23, %v318_v63  ;;  %v1187_v23 = vld [vmem:[#allocation4 + $0x30] sm:$0xff]  }
  0xdd   :  { %v213_v6 = vadd.s32 536870912, %v212_v4  ;;  %v345_v58 = vsel %vm257_vm15, 0, %v343_v55 }
  0xde   :  { %v322_v5 = vsub.s32 0, %v320_v3  ;;  %v349_v0 = vadd.s32 3, %v345_v58 }
  0xdf   :  { %v214_v8 = vshrl.u32 %v213_v6, 30 }
  0xe0   :  { %v1007_v7 = vmin.u32 %v322_v5, %v320_v3  ;;  %v350_v63 = vand.u32 3, %v349_v0 }
  0xe1   :  { %v215_v12 = vshll.u32 %v214_v8, 30  ;;  %v238_v62 = vsub.s32 4, %v214_v8 }
  0xe2   :  { %v324_v9 = vclz %v1007_v7  ;;  %vm355_vm2 = vcmp.eq.s32.totalorder %v350_v63, 2  ;;  %vm352_vm3 = vcmp.eq.s32.totalorder %v350_v63, 0  ;;  %vm351_vm4 = vcmp.lt.s32.totalorder %v350_v63, 2 }
  0xe3   :  { %v216_v16 = vsub.s32 %v212_v4, %v215_v12  ;;  %v239_v2 = vsel %vm154_vm0, %v238_v62, %v214_v8 }
  0xe4   :  { %v1008_v13 = vadd.s32 4294967294, %v324_v9  ;;  %v241_v4 = vsel %vm153_vm1, 0, %v239_v2 }
  0xe5   :  { %v218_v18 = vsub.s32 0, %v216_v16  ;;  %v245_v12 = vadd.s32 3, %v241_v4 }
  0xe6   :  { %vm1009_vm12 = vcmp.lt.s32.totalorder %v1008_v13, 0 }
  0xe7   :  { %v327_v17 = vsel %vm1009_vm12, 0, %v1008_v13  ;;  %v1003_v22 = vmin.u32 %v218_v18, %v216_v16 }
  0xe8   :  { %v328_v34 = vsub.s32 32, %v327_v17  ;;  %v332_v21 = vsub.s32 4294967266, %v327_v17  ;;  %v329_v24 = vshll.u32 %v320_v3, %v327_v17  ;;  %v246_v17 = vand.u32 3, %v245_v12 }
  0xe9   :  { %v220_v27 = vclz %v1003_v22 }
  0xea   :  { %v330_v25 = vshrl.u32 %v312_v19, %v328_v34  ;;  %v333_v26 = vadd.s32 127, %v332_v21  ;;  %vm251_vm6 = vcmp.eq.s32.totalorder %v246_v17, 2  ;;  %vm248_vm7 = vcmp.eq.s32.totalorder %v246_v17, 0 }
  0xeb   :  { %v1004_v36 = vadd.s32 4294967294, %v220_v27  ;;  %vm247_vm8 = vcmp.lt.s32.totalorder %v246_v17, 2 }
  0xec   :  { %v331_v29 = vor.u32 %v330_v25, %v329_v24  ;;  %v334_v33 = vshll.u32 %v333_v26, 23 }
  0xed   :  { %vm1005_vm13 = vcmp.lt.s32.totalorder %v1004_v36, 0 }
  0xee   :  { %v335_v38 = vor.u32 4788187, %v334_v33  ;;  %v338_v43 = vcvt.s32.f32 %v331_v29  ;;  %v223_v44 = vsel %vm1005_vm13, 0, %v1004_v36  ;;  %v1175_v29 = vld [vmem:[#allocation4] sm:$0xff]   ;;  %v1176_v33 = vld [vmem:[#allocation4 + $0x48] sm:$0xff]  }
  0xef   :  { %v224_v28 = vsub.s32 32, %v223_v44  ;;  %v228_v48 = vsub.s32 4294967266, %v223_v44  ;;  %v225_v30 = vshll.u32 %v216_v16, %v223_v44  ;;  %v1177_v36 = vld [vmem:[#allocation4 + $0x8] sm:$0xff]   ;;  %v1181_v44 = vld [vmem:[#allocation4 + $0x18] sm:$0xff]  }
  0xf0   :  { %v336_v41 = vand.u32 2147483647, %v335_v38  ;;  %v1178_v38 = vld [vmem:[#allocation4 + $0x50] sm:$0xff]  }
  0xf1   :  { %v226_v32 = vshrl.u32 %v208_v46, %v224_v28  ;;  %v229_v50 = vadd.s32 127, %v228_v48  ;;  %v1183_v46 = vld [vmem:[#allocation4 + $0x20] sm:$0xff]   ;;  %v1184_v28 = vld [vmem:[#allocation4 + $0x68] sm:$0xff]  }
  0xf2   :  { %v339_v20 = vmul.f32 %v338_v43, %v336_v41  ;;  %v1179_v41 = vld [vmem:[#allocation4 + $0x10] sm:$0xff]   ;;  %v1180_v43 = vld [vmem:[#allocation4 + $0x58] sm:$0xff]   ;;  %v1185_v48 = vld [vmem:[#allocation4 + $0x28] sm:$0xff]  }
  0xf3   :  { %v227_v52 = vor.u32 %v226_v32, %v225_v30  ;;  %v230_v53 = vshll.u32 %v229_v50, 23  ;;  %v1188_v30 = vld [vmem:[#allocation4 + $0x78] sm:$0xff]   ;;  %v394_v50 = vld [vmem:[%s1572_s4] sm:$0x3] }
  0xf4   :  { %v340_v51 = vxor.u32 2147483648, %v339_v20  ;;  %v1189_v32 = vld [vmem:[#allocation4 + $0x38] sm:$0xff]  }
  0xf5   :  { %v231_v57 = vor.u32 4788187, %v230_v53  ;;  %v234_v60 = vcvt.s32.f32 %v227_v52  ;;  %v403_v52 = vrot.slane %v394_v50, %v1339_v40 }
  0xf6   :  { %v341_v54 = vsel %vm258_vm14, %v340_v51, %v339_v20  ;;  %v1186_v20 = vld [vmem:[#allocation4 + $0x70] sm:$0xff]   ;;  %v399_v51 = vrot.slane %v394_v50, %v1337_v39 }
  0xf7   :  { %v344_v56 = vsel %vm257_vm15, %v1368_v11, %v341_v54  ;;  %v232_v59 = vand.u32 2147483647, %v231_v57  ;;  %v1174_v11 = vld [vmem:[#allocation4 + $0x40] sm:$0xff]  }
  0xf8   :  { %1190 = vcosq.f32 %v344_v56  ;;  %1067 = vmatprep.subr.bf16.mxu1 %v1174_v11 }
  0xf9   :  { %1192 = vsinq.f32 %v344_v56  ;;  %v235_v61 = vmul.f32 %v234_v60, %v232_v59  ;;  %1068 = vmatpush3.bf16.msra.mxu1 %v1175_v29 }
  0xfa   :  { %1069 = vmatprep.subr.bf16.mxu1 %v1176_v33 }
  0xfb   :  { %v236_v1 = vxor.u32 2147483648, %v235_v61 }
  0xfd   :  { %v237_v14 = vsel %vm154_vm0, %v236_v1, %v235_v61  ;;  %1070 = vmatpush3.bf16.msra.mxu1 %v1177_v36 }
  0xfe   :  { %v240_v31 = vsel %vm153_vm1, %v1366_v10, %v237_v14  ;;  %1071 = vmatprep.subr.bf16.mxu1 %v1178_v38  ;;  %v1182_v10 = vld [vmem:[#allocation4 + $0x60] sm:$0xff]  }
  0xff   :  { %1194 = vcosq.f32 %v240_v31 }
 0x100   :  { %1196 = vsinq.f32 %v240_v31 }
 0x101   :  { %1072 = vmatpush3.bf16.msra.mxu1 %v1179_v41 }
 0x102   :  { %v1191_v3 = vpop.eup %1190  ;;  %1073 = vmatprep.subr.bf16.mxu1 %v1180_v43 }
 0x103   :  { %v1193_v5 = vpop.eup %1192  ;;  %v356_v6 = vxor.u32 2147483648, %v1191_v3 }
 0x104   :  { %v353_v7 = vxor.u32 2147483648, %v1193_v5 }
 0x105   :  { %v357_v9 = vsel %vm355_vm2, %v356_v6, %v1193_v5  ;;  %1074 = vmatpush3.bf16.msra.mxu1 %v1181_v44 }
 0x106   :  { %v354_v13 = vsel %vm352_vm3, %v1191_v3, %v353_v7  ;;  %1075 = vmatprep.subr.bf16.mxu1 %v1182_v10 }
 0x107   :  { %v358_v15 = vsel %vm351_vm4, %v354_v13, %v357_v9 }
 0x108   :  { %v359_v8 = vsel %vm348_vm5, nan, %v358_v15 }
 0x109   :  { %v361_v16 = vpack.c.bf16 %v359_v8, %v359_v8  ;;  %v1195_v18 = vpop.eup %1194  ;;  %1076 = vmatpush3.bf16.msra.mxu1 %v1183_v46 }
 0x10a   :  { %v1197_v19 = vpop.eup %1196  ;;  %v252_v34 = vxor.u32 2147483648, %v1195_v18  ;;  %1077 = vmatprep.subr.bf16.mxu1 %v1184_v28 }
 0x10b   :  { %598 = vmatprep.mubr.bf16.mxu0 %v361_v16  ;;  %v249_v21 = vxor.u32 2147483648, %v1197_v19 }
 0x10c   :  { %v253_v22 = vsel %vm251_vm6, %v252_v34, %v1197_v19 }
 0x10d   :  { %v250_v24 = vsel %vm248_vm7, %v1195_v18, %v249_v21  ;;  %1078 = vmatpush3.bf16.msra.mxu1 %v1185_v48 }
 0x10e   :  { %v254_v25 = vsel %vm247_vm8, %v250_v24, %v253_v22  ;;  %1079 = vmatprep.subr.bf16.mxu1 %v1186_v20 }
 0x10f   :  { %v255_v26 = vsel %vm244_vm9, nan, %v254_v25 }
 0x110   :  { %v360_v27 = vpack.c.bf16 %v255_v26, %v255_v26 }
 0x111   :  { %1080 = vmatpush3.bf16.msra.mxu1 %v1187_v23 }
 0x112   :  { %599 = vmatmul.mubr.bf16.vlgmr.msra.gmra.mrb[0].mxu0 %v360_v27  ;;  %1081 = vmatprep.subr.bf16.mxu1 %v1188_v30 }
 0x115   :  { %1082 = vmatpush3.bf16.msra.mxu1 %v1189_v32 }
 0x1e5   :  { %v600_v53 = vpop.f32.mrb[0].mxu0 }
 0x1e6   :  { %v1463_v54 = vadd.f32 %v600_v53, %v399_v51  ;;  %v602_v55 = vpop.f32.mrb[1].mxu0 }
 0x1e7   :  { %v1465_v56 = vadd.f32 %v602_v55, %v403_v52  ;;  %v604_v57 = vpop.f32.mrb[2].mxu0 }
 0x1e8   :  { %v607_v58 = vand.u32 2147483647, %v1463_v54  ;;  %v610_v59 = vand.u32 2139095040, %v1463_v54  ;;  %v605_v60 = vpop.f32.mrb[3].mxu0  ;;  %vm609_vm9 = vcmp.lt.s32.totalorder %v1463_v54, 0 }
 0x1e9   :  { %v714_v61 = vand.u32 2139095040, %v1465_v56  ;;  %v711_v31 = vand.u32 2147483647, %v1465_v56 }
 0x1ea   :  { %v611_v62 = vshrl.u32 %v610_v59, 23  ;;  %v614_v39 = vand.u32 8388607, %v607_v58  ;;  %vm608_vm8 = vcmp.le.f32.partialorder %v607_v58, 0.7853982 }
 0x1eb   :  { %v715_v0 = vshrl.u32 %v714_v61, 23  ;;  %v1479_v12 = vand.u32 8388607, %v711_v31 }
 0x1ec   :  { %v1042_v40 = vadd.s32 4294967169, %v611_v62  ;;  %v615_v2 = vor.u32 8388608, %v614_v39 }
 0x1ed   :  { %v1046_v1 = vadd.s32 4294967169, %v715_v0 }
 0x1ee   :  { %v617_v14 = vadd.s32 1, %v1042_v40  ;;  %v1473_v7 = vshll.u32 %v615_v2, 8 }
 0x1ef   :  { %v721_v63 = vadd.s32 1, %v1046_v1 }
 0x1f0   :  { %vm618_vm10 = vcmp.gt.s32.totalorder %v617_v14, 0 }
 0x1f1   :  { %v619_v3 = vsel %vm618_vm10, %v617_v14, 0  ;;  %vm722_vm11 = vcmp.gt.s32.totalorder %v721_v63, 0  ;;  %vm713_vm10 = vcmp.lt.s32.totalorder %v1465_v56, 0 }
 0x1f2   :  { %v620_v4 = vshrl.u32 %v619_v3, 5  ;;  %v621_v5 = vand.u32 31, %v619_v3  ;;  %v723_v6 = vsel %vm722_vm11, %v721_v63, 0  ;;  %vm712_vm11 = vcmp.le.f32.partialorder %v711_v31, 0.7853982 }
 0x1f3   :  { %v1475_v9 = vshrl.u32 %v723_v6, 5  ;;  %v725_v16 = vand.u32 31, %v723_v6 }
 0x1f4   :  { %v622_v13 = vsub.s32 32, %v621_v5  ;;  %v624_v15 = vshll.u32 %v1266_v42, %v621_v5  ;;  %v627_v8 = vshll.u32 %v1268_v47, %v621_v5  ;;  %v630_v17 = vshll.u32 %v1269_v49, %v621_v5 }
 0x1f5   :  { %v633_v18 = vshll.u32 %v1264_v35, %v621_v5  ;;  %v636_v19 = vshll.u32 %v1265_v37, %v621_v5  ;;  %vm639_vm12 = vcmp.lt.s32.totalorder %v620_v4, 1  ;;  %vm640_vm13 = vcmp.lt.s32.totalorder %v620_v4, 2 }
 0x1f6   :  { %v625_v34 = vshrl.u32 %v1268_v47, %v622_v13  ;;  %v628_v21 = vshrl.u32 %v1269_v49, %v622_v13  ;;  %v631_v22 = vshrl.u32 %v1264_v35, %v622_v13  ;;  %v623_v24 = vshrl.u32 %v1266_v42, %v622_v13 }
 0x1f7   :  { %v634_v25 = vshrl.u32 %v1265_v37, %v622_v13  ;;  %v637_v26 = vshrl.u32 %v1267_v45, %v622_v13  ;;  %vm641_vm14 = vcmp.lt.s32.totalorder %v620_v4, 3  ;;  %v726_v33 = vsub.s32 32, %v725_v16 }
 0x1f8   :  { %v626_v27 = vor.u32 %v625_v34, %v624_v15  ;;  %v629_v11 = vor.u32 %v628_v21, %v627_v8  ;;  %v632_v29 = vor.u32 %v631_v22, %v630_v17  ;;  %vm642_vm15 = vcmp.lt.s32.totalorder %v620_v4, 4 }
 0x1f9   :  { %v635_v36 = vor.u32 %v634_v25, %v633_v18  ;;  %v638_v38 = vor.u32 %v637_v26, %v636_v19  ;;  %v737_v41 = vshll.u32 %v1264_v35, %v725_v16  ;;  %v738_v23 = vshrl.u32 %v1265_v37, %v726_v33 }
 0x1fa   :  { %v643_v43 = vsel %vm639_vm12, %v623_v24, %v626_v27  ;;  %v644_v44 = vsel %vm642_vm15, %v632_v29, 2102212464  ;;  %v647_v10 = vsel %vm639_vm12, %v626_v27, %v629_v11  ;;  %v651_v46 = vsel %vm639_vm12, %v629_v11, %v632_v29 }
 0x1fb   :  { %v645_v28 = vsel %vm641_vm14, %v629_v11, %v644_v44  ;;  %v648_v48 = vsel %vm642_vm15, %v635_v36, 920167782  ;;  %v652_v20 = vsel %vm642_vm15, %v638_v38, 1326507024  ;;  %v741_v51 = vshrl.u32 %v1267_v45, %v726_v33 }
 0x1fc   :  { %v646_v30 = vsel %vm640_vm13, %v643_v43, %v645_v28  ;;  %v649_v32 = vsel %vm641_vm14, %v632_v29, %v648_v48  ;;  %v653_v50 = vsel %vm641_vm14, %v635_v36, %v652_v20  ;;  %v739_v55 = vor.u32 %v738_v23, %v737_v41 }
 0x1fd   :  { %v650_v52 = vsel %vm640_vm13, %v647_v10, %v649_v32  ;;  %v654_v53 = vsel %vm640_vm13, %v651_v46, %v653_v50  ;;  %v740_v57 = vshll.u32 %v1265_v37, %v725_v16  ;;  %v662_v39 = vmul.u32 %v1473_v7, %v646_v30 }
 0x1fe   :  { %v1506_v59 = vmul.u32.u64.low %v1473_v7, %v654_v53  ;;  %v1507_v60 = vmul.u32.u64.high %v1473_v7, %v654_v53, %v1506_v59  ;;  %v1510_v61 = vmul.u32.u64.low %v1473_v7, %v650_v52  ;;  %v1511_v62 = vmul.u32.u64.high %v1473_v7, %v650_v52, %v1510_v61 }
 0x1ff   :  { %v742_v0 = vor.u32 %v741_v51, %v740_v57  ;;  %v719_v45 = vor.u32 8388608, %v1479_v12  ;;  %vm746_vm0 = vcmp.lt.s32.totalorder %v1475_v9, 4  ;;  %v728_v40 = vshll.u32 %v1266_v42, %v725_v16 }
 0x200   :  { %v729_v1 = vshrl.u32 %v1268_v47, %v726_v33  ;;  %v732_v37 = vshrl.u32 %v1269_v49, %v726_v33  ;;  %v731_v2 = vshll.u32 %v1268_v47, %v725_v16  ;;  %v734_v63 = vshll.u32 %v1269_v49, %v725_v16 }
 0x201   :  { %v756_v14 = vsel %vm746_vm0, %v742_v0, 1326507024  ;;  %v735_v3 = vshrl.u32 %v1264_v35, %v726_v33  ;;  %vm664_vm1 = vc.u32 %v1507_v60, %v1510_v61  ;;  %v665_v4 = vadd.s32 1, %v1511_v62 }
 0x202   :  { %v752_v5 = vsel %vm746_vm0, %v739_v55, 920167782  ;;  %v730_v6 = vor.u32 %v729_v1, %v728_v40  ;;  %v727_v7 = vshrl.u32 %v1266_v42, %v726_v33  ;;  %v733_v12 = vor.u32 %v732_v37, %v731_v2 }
 0x203   :  { %v736_v13 = vor.u32 %v735_v3, %v734_v63  ;;  %vm745_vm2 = vcmp.lt.s32.totalorder %v1475_v9, 3  ;;  %v666_v47 = vsel %vm664_vm1, %v665_v4, %v1511_v62  ;;  %vm743_vm3 = vcmp.lt.s32.totalorder %v1475_v9, 1 }
 0x204   :  { %vm744_vm4 = vcmp.lt.s32.totalorder %v1475_v9, 2  ;;  %v757_v35 = vsel %vm745_vm2, %v739_v55, %v756_v14  ;;  %v667_v49 = vadd.s32 %v666_v47, %v662_v39  ;;  %v751_v8 = vsel %vm743_vm3, %v730_v6, %v733_v12 }
 0x205   :  { %v748_v15 = vsel %vm746_vm0, %v736_v13, 2102212464  ;;  %v753_v16 = vsel %vm745_vm2, %v736_v13, %v752_v5  ;;  %v755_v17 = vsel %vm743_vm3, %v733_v12, %v736_v13  ;;  %v759_v18 = vshll.u32 %v719_v45, 8 }
 0x206   :  { %v754_v42 = vsel %vm744_vm4, %v751_v8, %v753_v16  ;;  %v668_v19 = vadd.s32 536870912, %v667_v49  ;;  %v747_v34 = vsel %vm743_vm3, %v727_v7, %v730_v6  ;;  %v749_v21 = vsel %vm745_vm2, %v733_v12, %v748_v15 }
 0x207   :  { %v758_v22 = vsel %vm744_vm4, %v755_v17, %v757_v35  ;;  %v1542_v26 = vmul.u32.u64.low %v759_v18, %v754_v42  ;;  %v1543_v27 = vmul.u32.u64.high %v759_v18, %v754_v42, %v1542_v26  ;;  %v750_v29 = vsel %vm744_vm4, %v747_v34, %v749_v21 }
 0x208   :  { %v1539_v24 = vmul.u32.u64.low %v759_v18, %v758_v22  ;;  %v1540_v25 = vmul.u32.u64.high %v759_v18, %v758_v22, %v1539_v24  ;;  %v669_v11 = vshrl.u32 %v668_v19, 30  ;;  %v766_v41 = vmul.u32 %v759_v18, %v750_v29 }
 0x209   :  { %v769_v36 = vadd.s32 1, %v1543_v27  ;;  %v663_v50 = vadd.s32 %v1510_v61, %v1507_v60  ;;  %vm699_vm15 = vweird.f32 %v1463_v54  ;;  %vm803_vm3 = vweird.f32 %v1465_v56 }
 0x20a   :  { %v670_v33 = vshll.u32 %v669_v11, 30  ;;  %vm768_vm5 = vc.u32 %v1540_v25, %v1542_v26  ;;  %v693_v63 = vsub.s32 4, %v669_v11  ;;  %v767_v60 = vadd.s32 %v1542_v26, %v1540_v25 }
 0x20b   :  { %v770_v43 = vsel %vm768_vm5, %v769_v36, %v1543_v27 }
 0x20c   :  { %v671_v38 = vsub.s32 %v667_v49, %v670_v33  ;;  %v771_v10 = vadd.s32 %v770_v43, %v766_v41  ;;  %v694_v49 = vsel %vm609_vm9, %v693_v63, %v669_v11 }
 0x20d   :  { %v696_v16 = vsel %vm608_vm8, 0, %v694_v49 }
 0x20e   :  { %v673_v44 = vsub.s32 0, %v671_v38  ;;  %v772_v28 = vadd.s32 536870912, %v771_v10  ;;  %v700_v34 = vadd.s32 3, %v696_v16 }
 0x210   :  { %v1043_v46 = vmin.u32 %v673_v44, %v671_v38  ;;  %v773_v20 = vshrl.u32 %v772_v28, 30  ;;  %v701_v24 = vand.u32 3, %v700_v34 }
 0x212   :  { %v675_v48 = vclz %v1043_v46  ;;  %v774_v30 = vshll.u32 %v773_v20, 30  ;;  %v797_v19 = vsub.s32 4, %v773_v20  ;;  %vm706_vm12 = vcmp.eq.s32.totalorder %v701_v24, 2 }
 0x213   :  { %vm703_vm13 = vcmp.eq.s32.totalorder %v701_v24, 0  ;;  %vm702_vm14 = vcmp.lt.s32.totalorder %v701_v24, 2 }
 0x214   :  { %v1044_v23 = vadd.s32 4294967294, %v675_v48  ;;  %v775_v9 = vsub.s32 %v771_v10, %v774_v30  ;;  %v798_v22 = vsel %vm713_vm10, %v797_v19, %v773_v20 }
 0x215   :  { %v800_v11 = vsel %vm712_vm11, 0, %v798_v22 }
 0x216   :  { %vm1045_vm6 = vcmp.lt.s32.totalorder %v1044_v23, 0  ;;  %v777_v53 = vsub.s32 0, %v775_v9 }
 0x217   :  { %v678_v32 = vsel %vm1045_vm6, 0, %v1044_v23 }
 0x218   :  { %v679_v51 = vsub.s32 32, %v678_v32  ;;  %v683_v52 = vsub.s32 4294967266, %v678_v32  ;;  %v680_v55 = vshll.u32 %v671_v38, %v678_v32  ;;  %v1047_v62 = vmin.u32 %v777_v53, %v775_v9 }
 0x219   :  { %v804_v38 = vadd.s32 3, %v800_v11 }
 0x21a   :  { %v681_v57 = vshrl.u32 %v663_v50, %v679_v51  ;;  %v684_v59 = vadd.s32 127, %v683_v52  ;;  %v779_v45 = vclz %v1047_v62  ;;  %v1050_v51 = vld [vmem:[%s1574_s6] ss:$0 sm:$0xff] }
 0x21b   :  { %v805_v44 = vand.u32 3, %v804_v38 }
 0x21c   :  { %v682_v39 = vor.u32 %v681_v57, %v680_v55  ;;  %v685_v0 = vshll.u32 %v684_v59, 23  ;;  %v1048_v1 = vadd.s32 4294967294, %v779_v45 }
 0x21d   :  { %vm810_vm0 = vcmp.eq.s32.totalorder %v805_v44, 2  ;;  %vm807_vm1 = vcmp.eq.s32.totalorder %v805_v44, 0  ;;  %vm806_vm2 = vcmp.lt.s32.totalorder %v805_v44, 2 }
 0x21e   :  { %v686_v40 = vor.u32 4788187, %v685_v0  ;;  %v689_v14 = vcvt.s32.f32 %v682_v39  ;;  %vm1049_vm7 = vcmp.lt.s32.totalorder %v1048_v1, 0 }
 0x21f   :  { %v782_v2 = vsel %vm1049_vm7, 0, %v1048_v1 }
 0x220   :  { %v687_v37 = vand.u32 2147483647, %v686_v40  ;;  %v783_v61 = vsub.s32 32, %v782_v2  ;;  %v787_v4 = vsub.s32 4294967266, %v782_v2  ;;  %v784_v6 = vshll.u32 %v775_v9, %v782_v2 }
 0x222   :  { %v690_v3 = vmul.f32 %v689_v14, %v687_v37  ;;  %v785_v7 = vshrl.u32 %v767_v60, %v783_v61  ;;  %v788_v12 = vadd.s32 127, %v787_v4 }
 0x224   :  { %v691_v5 = vxor.u32 2147483648, %v690_v3  ;;  %v786_v47 = vor.u32 %v785_v7, %v784_v6  ;;  %v789_v35 = vshll.u32 %v788_v12, 23 }
 0x226   :  { %v692_v13 = vsel %vm609_vm9, %v691_v5, %v690_v3  ;;  %v790_v8 = vor.u32 4788187, %v789_v35  ;;  %v793_v17 = vcvt.s32.f32 %v786_v47 }
 0x227   :  { %v695_v15 = vsel %vm608_vm8, %v1463_v54, %v692_v13 }
 0x228   :  { %1198 = vcosq.f32 %v695_v15  ;;  %v791_v42 = vand.u32 2147483647, %v790_v8 }
 0x229   :  { %1200 = vsinq.f32 %v695_v15 }
 0x22a   :  { %v794_v18 = vmul.f32 %v793_v17, %v791_v42 }
 0x22c   :  { %v795_v21 = vxor.u32 2147483648, %v794_v18 }
 0x22e   :  { %v796_v58 = vsel %vm713_vm10, %v795_v21, %v794_v18 }
 0x22f   :  { %v799_v25 = vsel %vm712_vm11, %v1465_v56, %v796_v58 }
 0x230   :  { %1202 = vcosq.f32 %v799_v25 }
 0x231   :  { %1204 = vsinq.f32 %v799_v25 }
 0x232   :  { %v1199_v26 = vpop.eup %1198 }
 0x233   :  { %v1201_v27 = vpop.eup %1200  ;;  %v707_v29 = vxor.u32 2147483648, %v1199_v26 }
 0x234   :  { %v704_v33 = vxor.u32 2147483648, %v1201_v27 }
 0x235   :  { %v708_v36 = vsel %vm706_vm12, %v707_v29, %v1201_v27 }
 0x236   :  { %v705_v41 = vsel %vm703_vm13, %v1199_v26, %v704_v33 }
 0x237   :  { %v709_v31 = vsel %vm702_vm14, %v705_v41, %v708_v36 }
 0x238   :  { %v710_v43 = vsel %vm699_vm15, nan, %v709_v31 }
 0x239   :  { %v815_v50 = vpack.c.bf16 %v710_v43, %v710_v43 }
 0x23a   :  { %v1203_v10 = vpop.eup %1202 }
 0x23b   :  { %v1205_v46 = vpop.eup %1204  ;;  %v811_v28 = vxor.u32 2147483648, %v1203_v10 }
 0x23c   :  { %v808_v48 = vxor.u32 2147483648, %v1205_v46 }
 0x23d   :  { %v812_v20 = vsel %vm810_vm0, %v811_v28, %v1205_v46 }
 0x23e   :  { %v809_v23 = vsel %vm807_vm1, %v1203_v10, %v808_v48 }
 0x23f   :  { %v813_v30 = vsel %vm806_vm2, %v809_v23, %v812_v20 }
 0x240   :  { %v814_v9 = vsel %vm803_vm3, nan, %v813_v30 }
 0x241   :  { %v816_v32 = vpack.c.bf16 %v814_v9, %v814_v9 }
 0x243   :  { %984 = vmatprep.mubr.bf16.mxu1 %v816_v32 }
 0x244   :  { %985 = vmatmul.mubr.bf16.vlgmr.msra.gmra.mrb[0].mxu1 %v815_v50 }
 0x317   :  { %v1083_v54 = vpop.f32.mrb[0].mxu1 }
 0x318   :  { %v1084_v52 = vpop.f32.mrb[1].mxu1 }
 0x319   :  { %v1085_v53 = vadd.f32 %v1084_v52, %v1083_v54  ;;  %v1086_v55 = vpop.f32.mrb[2].mxu1 }
 0x31a   :  { %v1087_v57 = vpop.f32.mrb[3].mxu1 }
 0x31b   :  { %v987_v59 = vadd.f32 %v1085_v53, %v1050_v51 }
 0x31d   :  { %992 = vst [vmem:[%s1575_s7] sm:$0xff] %v987_v59 }
 0x31e   :  { %997 = vsyncpa [#allocation3], 1 }
 0x31f   :  { %998 = vsyncpa [#allocation5], 1 }

</bundles_post_ra>
